<compile_context>
chip_gen: v5e
topology: v5e:2x2
jax: 0.10.0
libtpu: 0.0.40
codegen_flags: <defaults>
</compile_context>

<pallas_src>
import jax
import jax.numpy as jnp
from jax.experimental import pallas as pl
from jax.experimental.pallas import tpu as pltpu


# Below this size, a Pallas launch costs far more than the copy itself.
_SMALL_BYTES_DEFAULT = 1 << 20      # 1 MiB
# Above this size, use multiple in-flight DMA descriptors.
_CHUNK_BYTES_DEFAULT = 8 << 20      # 8 MiB
_MAX_DMA_CHUNKS = 8


def _make_hbm_copy_kernel(chunk_bounds):
    """Identity as K concurrent HBM->HBM DMAs: no VMEM staging, no tiling.

    `chunk_bounds` is a static Python list of (start, size) ranges along the
    leading axis (contiguous memory ranges in row-major layout).  All DMAs
    are started before any wait so up to K descriptors are in flight.
    """

    def kernel(x_hbm_ref, o_hbm_ref, copy_sems):
        copies = []
        for k, (start, size) in enumerate(chunk_bounds):
            cp = pltpu.make_async_copy(
                x_hbm_ref.at[pl.ds(start, size)],
                o_hbm_ref.at[pl.ds(start, size)],
                copy_sems.at[k],
            )
            cp.start()
            copies.append(cp)
        for cp in copies:
            cp.wait()

    return kernel


def abstract_encoder_transform(
    x: jax.Array,
    *,
    small_bytes: int = _SMALL_BYTES_DEFAULT,
    chunk_bytes: int = _CHUNK_BYTES_DEFAULT,
) -> jax.Array:
    """Pallas equivalent of AbstractEncoder.transform (identity), as an
    explicitly materialized copy.

    Dispatch:
      * size == 0 or 0-d or < `small_bytes`  -> plain XLA copy (no Pallas).
      * otherwise                            -> HBM->HBM DMA kernel; if
        >= `chunk_bytes`, split into up to 8 concurrent DMA descriptors.
    """
    if x.size == 0 or x.ndim == 0:
        return jnp.copy(x)

    nbytes = x.size * x.dtype.itemsize
    if nbytes < small_bytes:
        # Let XLA materialize (and possibly fuse/elide) the copy; avoids
        # custom-call launch + descriptor-setup overhead for tiny tensors.
        return jnp.copy(x)

    # Static (trace-time) partition of the leading axis into contiguous
    # row-ranges. One chunk -> single descriptor; many -> concurrent DMAs.
    lead = x.shape[0]
    if nbytes >= chunk_bytes and lead > 1:
        num_chunks = min(_MAX_DMA_CHUNKS, lead)
    else:
        num_chunks = 1
    base, rem = divmod(lead, num_chunks)
    chunk_bounds = []
    start = 0
    for k in range(num_chunks):
        size = base + (1 if k < rem else 0)
        chunk_bounds.append((start, size))
        start += size

    kernel = _make_hbm_copy_kernel(chunk_bounds)
    return pl.pallas_call(
        kernel,
        out_shape=jax.ShapeDtypeStruct(x.shape, x.dtype),
        in_specs=[pl.BlockSpec(memory_space=pl.ANY)],   # raw HBM ref, no auto-DMA
        out_specs=pl.BlockSpec(memory_space=pl.ANY),    # raw HBM ref
        scratch_shapes=[pltpu.SemaphoreType.DMA((num_chunks,))],
        cost_estimate=pl.CostEstimate(
            flops=0, transcendentals=0, bytes_accessed=2 * nbytes),
    )(x)


class AbstractEncoderPallas:
    """Minimal JAX-side mirror of the PyTorch AbstractEncoder.

    `forward` / `feature_dim` are abstract in the original; only `transform`
    (identity) is concrete.  The default `transform` path returns `x`
    untouched (zero HBM traffic) — prefer it in hot loops; `materialize=True`
    forces a fresh output buffer via the copy path above.
    """

    @property
    def feature_dim(self):
        raise NotImplementedError("abstract property in the source module")

    def transform(self, x, *, materialize: bool = False, **copy_kwargs):
        if materialize:
            return abstract_encoder_transform(x, **copy_kwargs)
        return x

    def forward(self, x):
        raise NotImplementedError("abstract method in the source module")

    # TODO(synk): load_weights / .to(device) are torch checkpoint-file I/O and
    # device placement — no Pallas-kernel equivalent (explicitly out of scope).


if __name__ == "__main__":
    key = jax.random.PRNGKey(0)
    # Small NCHW image batch consistent with an encoder input.
    x = jax.random.normal(key, (2, 4, 16, 16), dtype=jnp.float32)

    enc = AbstractEncoderPallas()

    # 1. Default fast path: identity elided entirely (zero HBM traffic).
    z = enc.transform(x)
    assert z is x

    # 2. Materialize, small-tensor path: plain XLA copy, no Pallas launch.
    y_small = jax.block_until_ready(enc.transform(x, materialize=True))
    assert y_small.shape == x.shape and y_small.dtype == x.dtype
    assert bool(jnp.all(y_small == x))

    # 3. Pallas single-descriptor HBM->HBM DMA path (force by lowering the
    #    small-tensor cutoff so the kernel actually runs on this tiny input).
    y_dma = jax.block_until_ready(
        enc.transform(x, materialize=True, small_bytes=0))
    assert y_dma.shape == x.shape and y_dma.dtype == x.dtype
    assert bool(jnp.all(y_dma == x))

    # 4. Pallas multi-descriptor (chunked) DMA path, forced thresholds.
    y_chunk = jax.block_until_ready(
        enc.transform(x, materialize=True, small_bytes=0, chunk_bytes=0))
    assert y_chunk.shape == x.shape and y_chunk.dtype == x.dtype
    assert bool(jnp.all(y_chunk == x))

    print("KERNEL_OK")
</pallas_src>

<mosaic_0001>
module attributes {stable_mosaic.version = 11 : i64} {
  func.func @kernel(%arg0: memref<2x4x16x16xf32, #tpu.memory_space<any>>, %arg1: memref<2x4x16x16xf32, #tpu.memory_space<any>>, %arg2: memref<1x!tpu.dma_semaphore, #tpu.memory_space<semaphore_mem>>) attributes {dimension_semantics = [], scalar_prefetch = 0 : i64, scratch_operands = 1 : i64, tpu.core_type = #tpu.core_type<tc>} {
    %c0_i32 = arith.constant 0 : i32
    %c0_i32_0 = arith.constant 0 : i32
    %c0_i32_1 = arith.constant 0 : i32
    %c0_i32_2 = arith.constant 0 : i32
    %c0_i32_3 = arith.constant 0 : i32
    %0 = tpu.memref_slice %arg0[%c0_i32_0, %c0_i32_1, %c0_i32_2, %c0_i32_3] : memref<2x4x16x16xf32, #tpu.memory_space<any>> -> memref<2x4x16x16xf32, #tpu.memory_space<any>>
    %c0_i32_4 = arith.constant 0 : i32
    %c0_i32_5 = arith.constant 0 : i32
    %c0_i32_6 = arith.constant 0 : i32
    %c0_i32_7 = arith.constant 0 : i32
    %1 = tpu.memref_slice %arg1[%c0_i32_4, %c0_i32_5, %c0_i32_6, %c0_i32_7] : memref<2x4x16x16xf32, #tpu.memory_space<any>> -> memref<2x4x16x16xf32, #tpu.memory_space<any>>
    %2 = tpu.memref_slice %arg2[%c0_i32] : memref<1x!tpu.dma_semaphore, #tpu.memory_space<semaphore_mem>> -> memref<1x!tpu.dma_semaphore, #tpu.memory_space<semaphore_mem>>
    %3 = tpu.memref_squeeze %2 : memref<1x!tpu.dma_semaphore, #tpu.memory_space<semaphore_mem>> -> memref<!tpu.dma_semaphore, #tpu.memory_space<semaphore_mem>>
    tpu.enqueue_dma source(%0 : memref<2x4x16x16xf32, #tpu.memory_space<any>>) target(%1 : memref<2x4x16x16xf32, #tpu.memory_space<any>>) target_semaphore(%3 : memref<!tpu.dma_semaphore, #tpu.memory_space<semaphore_mem>>)
    %c0_i32_8 = arith.constant 0 : i32
    %c0_i32_9 = arith.constant 0 : i32
    %c0_i32_10 = arith.constant 0 : i32
    %c0_i32_11 = arith.constant 0 : i32
    %c0_i32_12 = arith.constant 0 : i32
    %4 = tpu.memref_slice %arg0[%c0_i32_9, %c0_i32_10, %c0_i32_11, %c0_i32_12] : memref<2x4x16x16xf32, #tpu.memory_space<any>> -> memref<2x4x16x16xf32, #tpu.memory_space<any>>
    %c0_i32_13 = arith.constant 0 : i32
    %c0_i32_14 = arith.constant 0 : i32
    %c0_i32_15 = arith.constant 0 : i32
    %c0_i32_16 = arith.constant 0 : i32
    %5 = tpu.memref_slice %arg1[%c0_i32_13, %c0_i32_14, %c0_i32_15, %c0_i32_16] : memref<2x4x16x16xf32, #tpu.memory_space<any>> -> memref<2x4x16x16xf32, #tpu.memory_space<any>>
    %6 = tpu.memref_slice %arg2[%c0_i32_8] : memref<1x!tpu.dma_semaphore, #tpu.memory_space<semaphore_mem>> -> memref<1x!tpu.dma_semaphore, #tpu.memory_space<semaphore_mem>>
    %7 = tpu.memref_squeeze %6 : memref<1x!tpu.dma_semaphore, #tpu.memory_space<semaphore_mem>> -> memref<!tpu.dma_semaphore, #tpu.memory_space<semaphore_mem>>
    tpu.wait_dma2 semaphore(%7 : memref<!tpu.dma_semaphore, #tpu.memory_space<semaphore_mem>>) src(%4 : memref<2x4x16x16xf32, #tpu.memory_space<any>>) dst(%5 : memref<2x4x16x16xf32, #tpu.memory_space<any>>)
    return
  }
}

</mosaic_0001>

<bundles_post_ra>
// kernel: tpu_custom_call.1
= control target key start
LH: loop header
LB: loop body
LE: loop exit
PB: predicated region body
PF: predicated region fallthrough
CT: control target
= control target key end

     0   :  { %s34_s12 = smov [#allocation2]   ;;  %s35_s13 = smov [#allocation3]   ;;  %s53_s0 = inlined_call_operand.hbm [shape: f32[2,4,16,16], index: 0, kind: input, shape index: {}]   ;;  %s54_s1 = inlined_call_operand.hbm [shape: f32[2,4,16,16], index: 1, kind: output, shape index: {}]  }
   0x1   :  { %s10_s8 = sshll.u32 %s53_s0, 4  ;;  %s12_s11 = sshll.u32 %s54_s1, 4  ;;  %s11_s8 = int_to_ptr.hbm [resolvable:$true] %s10_s8  ;;  %s13_s11 = int_to_ptr.hbm [resolvable:$true] %s12_s11 }
   0x2   :  { %s36_s14 = smov 0  }
   0x3   :  { %16 = dma.general %s11_s8, 2048, %s13_s11, %s34_s12, %s35_s13, [#allocation4], %s36_s14, 0  }
   0x4   :  { %32 = dma.done.wait [#allocation2], 2048 }
   0x5   :  { %33 = vsyncadd [#allocation2], 4294965248 }
   0x6   :  { %22 = vsyncmov [#allocation2] }
   0x9   :  { %s23_s15 = vpop.sfrf %22 }
   0xa   :  { %p28_p0 = scmp.ne.s32.totalorder %s23_s15, 0 }
   0xc   :  { %27 = shalt.err (%p28_p0)  }

</bundles_post_ra>
